<compile_context>
chip_gen: v6e
topology: v6e:2x2x1
jax: 0.10.0
libtpu: 0.0.40
codegen_flags: <defaults>
</compile_context>

<pallas_src>
import jax
import jax.numpy as jnp
from jax.experimental import pallas as pl
from jax.experimental.pallas import tpu as pltpu

F32 = jnp.float32
BF16 = jnp.bfloat16

_ROW_TILE = 128  # row tile (multiple of 8 sublanes) used when R = B*C is large


# ============================ Pallas kernel ============================

def _upsample_wave_kernel(x_ref, m_ref, o_ref):
    """x_ref: (r, W) bf16 wave rows.  m_ref: (W, 2W) bf16 blur matrix.
    o_ref: (r, 2W) f32 upsampled+blurred rows (already interleaved, lane-dense)."""
    o_ref[...] = jnp.dot(x_ref[...], m_ref[...], preferred_element_type=F32)


# ============================ wrapper ============================

def _blur_matrix(W: int) -> jax.Array:
    """(W, 2W) banded matrix of zero-stuff-x2 + [1,3,3,1]/8 blur (exact in bf16)."""
    row = jax.lax.broadcasted_iota(jnp.int32, (W, 2 * W), 0)
    col = jax.lax.broadcasted_iota(jnp.int32, (W, 2 * W), 1)
    d = col - 2 * row
    m = jnp.where((d == 0) | (d == 1), 0.375,
                  jnp.where((d == -1) | (d == 2), 0.125, 0.0))
    return m.astype(BF16)


def upsample_wave(x):
    """UpSampleWave forward.  x: (B, C, H, W) float32 with H == 1 (wave layout)."""
    B, C, H, W = x.shape
    if H != 1:
        # TODO(synk): the PyTorch reshape gymnastics for H > 1 are not implemented;
        # the module is only ever used on waves with H == 1.
        raise NotImplementedError("UpSampleWave Pallas kernel supports H == 1 only")
    R = B * C
    W2 = 2 * W

    # bf16 MXU operands: the [1,3,3,1]/8 taps are exact in bf16 and the f32
    # accumulate keeps the output f32.  (Genuine-f32 activations trade ~8
    # mantissa bits, same ballpark as the MXU's own bf16 multi-pass f32 path.)
    rows = x.reshape(R, W).astype(BF16)          # free row-major merge
    m = _blur_matrix(W)                          # constant-folded under jit

    # TODO(synk): for very large W (dense M ~ 4*W^2 bytes would press v7x's
    # 64 MiB VMEM / v5e's 16 MiB scoped default) switch to a W-tiled banded M
    # with a 1-element halo and set vmem_limit_bytes explicitly.
    cost = pl.CostEstimate(
        flops=2 * R * W * W2,
        transcendentals=0,
        bytes_accessed=R * W * 2 + W * W2 * 2 + R * W2 * 4,
    )
    out_shape = jax.ShapeDtypeStruct((R, W2), F32)

    if R >= 2 * _ROW_TILE and R % _ROW_TILE == 0:
        # Row-parallel grid: fills the MXU M-dimension and lets v7x's two
        # TensorCores split the rows; M is the same (resident) block each step.
        out = pl.pallas_call(
            _upsample_wave_kernel,
            out_shape=out_shape,
            grid=(R // _ROW_TILE,),
            in_specs=[pl.BlockSpec((_ROW_TILE, W), lambda i: (i, 0)),
                      pl.BlockSpec((W, W2), lambda i: (0, 0))],
            out_specs=pl.BlockSpec((_ROW_TILE, W2), lambda i: (i, 0)),
            compiler_params=pltpu.CompilerParams(
                dimension_semantics=("parallel",)),
            cost_estimate=cost,
        )(rows, m)
    else:
        # Small R (e.g. 6 rows): gridless whole-array block, one MXU push.
        out = pl.pallas_call(
            _upsample_wave_kernel,
            out_shape=out_shape,
            cost_estimate=cost,
        )(rows, m)

    return out.reshape(B, C, 1, W2)              # free row-major split


# ------------------ pure-jnp reference (mirrors the torch module) ------------------

def upsample_wave_ref(x):
    B, C, H, W = x.shape
    xr = x.reshape(B, C, W, H)
    xr = jnp.pad(xr, ((0, 0), (0, 0), (0, 0), (0, 1)))      # pad (0, 1)
    u = xr.reshape(B, C, H, -1)                              # zero-stuffed, width 2W
    u = jnp.pad(u, ((0, 0), (0, 0), (0, 0), (2, 1)))         # pad (2, 1)
    k = jnp.array([1.0, 3.0, 3.0, 1.0], F32) / 8.0
    return (u[..., 0:-3] * k[0] + u[..., 1:-2] * k[1]
            + u[..., 2:-1] * k[2] + u[..., 3:] * k[3])


# ----------------------------------- main -----------------------------------

if __name__ == "__main__":
    jitted = jax.jit(upsample_wave)

    # Case 1: module-sized wave (C = 3 is fixed by the module's blur filter).
    B, C, H, W = 2, 3, 1, 64
    x = jax.random.normal(jax.random.PRNGKey(0), (B, C, H, W), dtype=F32)
    x = x.astype(BF16).astype(F32)     # bf16-representable -> MXU check is exact
    out = jitted(x)
    jax.block_until_ready(out)
    assert out.shape == (B, C, H, 2 * W), out.shape
    err = float(jnp.max(jnp.abs(out - upsample_wave_ref(x))))
    assert err < 1e-5, err
    assert bool(jnp.all(jnp.isfinite(out)))

    # Case 2: batched waves -> exercises the row-tiled "parallel" grid path.
    B2, C2, H2, W_big = 128, 3, 1, 128            # R = 384 rows -> 3 tiles of 128
    x2 = jax.random.normal(jax.random.PRNGKey(1), (B2, C2, H2, W_big), dtype=F32)
    x2 = x2.astype(BF16).astype(F32)
    out2 = jitted(x2)
    jax.block_until_ready(out2)
    assert out2.shape == (B2, C2, H2, 2 * W_big), out2.shape
    err2 = float(jnp.max(jnp.abs(out2 - upsample_wave_ref(x2))))
    assert err2 < 1e-5, err2
    assert bool(jnp.all(jnp.isfinite(out2)))

    print("KERNEL_OK")
</pallas_src>

<mosaic_0001>
module attributes {stable_mosaic.version = 11 : i64} {
  func.func @_upsample_wave_kernel(%arg0: memref<6x64xbf16, #tpu.memory_space<vmem>>, %arg1: memref<64x128xbf16, #tpu.memory_space<vmem>>, %arg2: memref<6x128xf32, #tpu.memory_space<vmem>>) attributes {dimension_semantics = [], scalar_prefetch = 0 : i64, scratch_operands = 0 : i64, tpu.core_type = #tpu.core_type<tc>} {
    %c0 = arith.constant 0 : index
    %c0_0 = arith.constant 0 : index
    %0 = vector.load %arg0[%c0, %c0_0] : memref<6x64xbf16, #tpu.memory_space<vmem>>, vector<6x64xbf16>
    %c0_1 = arith.constant 0 : index
    %c0_2 = arith.constant 0 : index
    %1 = vector.load %arg1[%c0_1, %c0_2] : memref<64x128xbf16, #tpu.memory_space<vmem>>, vector<64x128xbf16>
    %cst = arith.constant dense<0.000000e+00> : vector<6x128xf32>
    %2 = tpu.matmul %0, %1, %cst {dimension_numbers = #tpu.dot_dimension_numbers<[1], [0], [0], [1], [0, 0, 1, 1], [], []>} : vector<6x64xbf16>, vector<64x128xbf16>, vector<6x128xf32> -> vector<6x128xf32>
    %c0_3 = arith.constant 0 : index
    %c0_4 = arith.constant 0 : index
    %3 = vector.load %arg2[%c0_3, %c0_4] : memref<6x128xf32, #tpu.memory_space<vmem>>, vector<6x128xf32>
    tpu.vector_store %arg2[%c0_3, %c0_4], %2 {strides = array<i32>} : memref<6x128xf32, #tpu.memory_space<vmem>>, vector<6x128xf32>,
    return
  }
}

</mosaic_0001>

<bundles_post_ra>
// kernel: upsample_wave.1
= control target key start
LH: loop header
LB: loop body
LE: loop exit
PB: predicated region body
PF: predicated region fallthrough
CT: control target
= control target key end

     0   :  { %v122_v0 = vmov 0.0   ;;  %vm123_vm0 = vmmov 0   ;;  %vm45_vm1 = vcmask 523264   ;;  %s157_s1 = inlined_call_operand.vmem [shape: bf16[64,128], index: 1, kind: input, shape index: {}]   ;;  %s158_s0 = inlined_call_operand.vmem [shape: bf16[6,64], index: 0, kind: input, shape index: {}]   ;;  %s159_s2 = inlined_call_operand.vmem [shape: f32[6,128], index: 2, kind: output, shape index: {}]  }
   0x1   :  { %104 = vmatprep.subr.bf16.mxu0 %v122_v0  ;;  %v118_v1 = vld [vmem:[%s157_s1 + $0x18] sm:$0xff]   ;;  %112 = vmatprep.mubr.msk.bf16.mxu0 %vm123_vm0, %v122_v0  ;;  %v119_v2 = vld [vmem:[%s157_s1 + $0x10] sm:$0xff]   ;;  %v120_v3 = vld [vmem:[%s157_s1 + $0x8] sm:$0xff]  }
   0x2   :  { %105 = vmatpush3.bf16.msra.mxu0 %v118_v1  ;;  %v121_v4 = vld [vmem:[%s157_s1] sm:$0xff]  }
   0x3   :  { %106 = vmatprep.subr.bf16.mxu0 %v122_v0  ;;  %v12_v5 = vld [vmem:[%s158_s0] sm:$0x7] }
   0x6   :  { %107 = vmatpush3.bf16.msra.mxu0 %v119_v2 }
   0x7   :  { %108 = vmatprep.subr.bf16.mxu0 %v122_v0 }
   0xa   :  { %109 = vmatpush3.bf16.msra.mxu0 %v120_v3 }
   0xb   :  { %110 = vmatprep.subr.bf16.mxu0 %v122_v0 }
   0xe   :  { %111 = vmatpush3.bf16.msra.mxu0 %v121_v4 }
  0x11   :  { %113 = vmatmul.mubr.msk.bf16.vlgmr.msra.gmra.mxu0 %vm45_vm1, %v12_v5 }
  0xd1   :  { %v83_v6 = vpop.f32.mrf.mxu0 }
  0xd2   :  { %89 = vst [vmem:[%s159_s2] sm:$0x3f] %v83_v6 }
  0xd3   :  { %v114_v7 = vpop.f32.mrf.mxu0 }
  0xd5   :  { %v86_v8 = vpop.f32.mrf.mxu0 }
  0xd7   :  { %v115_v9 = vpop.f32.mrf.mxu0 }

</bundles_post_ra>
